<compile_context>
chip_gen: v5e
topology: v5e:2x2
jax: 0.10.0
libtpu: 0.0.40
codegen_flags: <defaults>
</compile_context>

<pallas_src>
import jax
import jax.numpy as jnp
import numpy as np
from jax.experimental import pallas as pl
from jax.experimental.pallas import tpu as pltpu


def _basic_block_q3_kernel(x_ref, w1_ref, s1_ref, sh1_ref, a1_ref,
                           w2_ref, s2_ref, sh2_ref, ae_ref, o_ref):
    """One (batch, spatial-tile) grid step, channels-major layout.

    x_ref  : (1, C, T) f32   input tile (C on sublanes, spatial T on lanes)
    w1_ref : (C, C)    bf16  conv1 1x1 weight (out, in)
    s1/sh1 : (C, 1)    f32   folded BN1 scale / shift (conv1 bias folded in)
    a1_ref : (1, 1)    f32   PReLU1 slope
    w2_ref : (C, C)    bf16  conv2 1x1 weight (out, in)
    s2/sh2 : (C, 1)    f32   folded BN2 scale / shift (conv2 bias folded in)
    ae_ref : (1, 1)    f32   PReLU_end slope
    o_ref  : (1, C, T) f32   output tile
    """
    x = x_ref[0]                                              # (C, T) f32

    # ---- conv1 (1x1) == channel matmul (bf16 MXU, f32 acc) + BN1 + PReLU1 ----
    t1 = jnp.dot(w1_ref[...], x.astype(jnp.bfloat16),
                 preferred_element_type=jnp.float32)          # (C, T)
    t1 = t1 * s1_ref[...] + sh1_ref[...]                      # BN1 (+ conv1 bias)
    a1 = a1_ref[0, 0]
    t1 = jnp.where(t1 > 0, t1, a1 * t1)                       # PReLU1 (scalar slope)

    # ---- conv2 (1x1) + BN2 ----
    t2 = jnp.dot(w2_ref[...], t1.astype(jnp.bfloat16),
                 preferred_element_type=jnp.float32)          # (C, T)
    t2 = t2 * s2_ref[...] + sh2_ref[...]                      # BN2 (+ conv2 bias)

    # ---- identity residual add + PReLU_end ----
    o = t2 + x
    ae = ae_ref[0, 0]
    o_ref[0] = jnp.where(o > 0, o, ae * o).astype(o_ref.dtype)


def _spatial_tile(hw):
    for t in (2048, 1024, 512, 256, 128):
        if hw % t == 0:
            return t
    return hw


@jax.jit
def basic_block_q3(x_nchw, w1, b1, g1, bt1, m1, v1, a1,
                   w2, b2, g2, bt2, m2, v2, a_end, eps=1e-5):
    N, C, H, W = x_nchw.shape
    HW = H * W
    T = _spatial_tile(HW)

    # Fold conv bias + BN (eval mode) into per-output-channel scale/shift.
    s1 = g1 / jnp.sqrt(v1 + eps)
    sh1 = bt1 + s1 * (b1 - m1)
    s2 = g2 / jnp.sqrt(v2 + eps)
    sh2 = bt2 + s2 * (b2 - m2)

    # Channels-major, spatial flattened onto the lane axis (lane-dense I/O).
    x_flat = x_nchw.reshape(N, C, HW)

    grid_spec = pltpu.PrefetchScalarGridSpec(
        num_scalar_prefetch=0,
        grid=(N, HW // T),
        in_specs=[
            pl.BlockSpec((1, C, T), lambda n, t: (n, 0, t)),
            pl.BlockSpec((C, C), lambda n, t: (0, 0)),
            pl.BlockSpec((C, 1), lambda n, t: (0, 0)),
            pl.BlockSpec((C, 1), lambda n, t: (0, 0)),
            pl.BlockSpec((1, 1), lambda n, t: (0, 0)),
            pl.BlockSpec((C, C), lambda n, t: (0, 0)),
            pl.BlockSpec((C, 1), lambda n, t: (0, 0)),
            pl.BlockSpec((C, 1), lambda n, t: (0, 0)),
            pl.BlockSpec((1, 1), lambda n, t: (0, 0)),
        ],
        out_specs=pl.BlockSpec((1, C, T), lambda n, t: (n, 0, t)),
    )

    out = pl.pallas_call(
        _basic_block_q3_kernel,
        out_shape=jax.ShapeDtypeStruct((N, C, HW), jnp.float32),
        grid_spec=grid_spec,
        compiler_params=pltpu.CompilerParams(
            dimension_semantics=("parallel", "parallel")),
    )(x_flat,
      w1.astype(jnp.bfloat16), s1.reshape(C, 1), sh1.reshape(C, 1),
      jnp.reshape(a1, (1, 1)).astype(jnp.float32),
      w2.astype(jnp.bfloat16), s2.reshape(C, 1), sh2.reshape(C, 1),
      jnp.reshape(a_end, (1, 1)).astype(jnp.float32))

    return out.reshape(N, C, H, W)


def _reference(x, w1, b1, g1, bt1, m1, v1, a1,
               w2, b2, g2, bt2, m2, v2, a_end, eps=1e-5):
    """Pure-JAX/XLA reference in f32, PyTorch NCHW layout, eval-mode BN."""
    def bn(y, g, bt, m, v):
        return (g[None, :, None, None] * (y - m[None, :, None, None])
                / jnp.sqrt(v[None, :, None, None] + eps) + bt[None, :, None, None])

    y = jnp.einsum('oi,nihw->nohw', w1, x) + b1[None, :, None, None]
    y = bn(y, g1, bt1, m1, v1)
    y = jnp.where(y > 0, y, a1 * y)
    y = jnp.einsum('oi,nihw->nohw', w2, y) + b2[None, :, None, None]
    y = bn(y, g2, bt2, m2, v2)
    y = y + x
    y = jnp.where(y > 0, y, a_end * y)
    return y


if __name__ == "__main__":
    # inplanes == planes == 32 -> self.downsample is False (identity-residual path).
    N, C, H, W = 2, 32, 16, 16
    eps = 1e-5

    key = jax.random.PRNGKey(0)
    ks = jax.random.split(key, 13)

    x = jax.random.normal(ks[0], (N, C, H, W), jnp.float32)

    # conv1: 1x1 C->C (PyTorch weight (C, C, 1, 1) -> stored as (C, C)) + bias
    w1 = jax.random.normal(ks[1], (C, C), jnp.float32) * 0.1
    b1 = jax.random.normal(ks[2], (C,), jnp.float32) * 0.1
    g1 = 0.5 + jax.random.uniform(ks[3], (C,), jnp.float32)
    bt1 = jax.random.normal(ks[4], (C,), jnp.float32) * 0.1
    m1 = jax.random.normal(ks[5], (C,), jnp.float32) * 0.1
    v1 = 0.5 + jax.random.uniform(ks[6], (C,), jnp.float32)
    a1 = jnp.float32(0.25)                                   # PReLU default init

    # conv2: 1x1 C->C + bias
    w2 = jax.random.normal(ks[7], (C, C), jnp.float32) * 0.1
    b2 = jax.random.normal(ks[8], (C,), jnp.float32) * 0.1
    g2 = 0.5 + jax.random.uniform(ks[9], (C,), jnp.float32)
    bt2 = jax.random.normal(ks[10], (C,), jnp.float32) * 0.1
    m2 = jax.random.normal(ks[11], (C,), jnp.float32) * 0.1
    v2 = 0.5 + jax.random.uniform(ks[12], (C,), jnp.float32)
    a_end = jnp.float32(0.25)

    out = basic_block_q3(x, w1, b1, g1, bt1, m1, v1, a1,
                         w2, b2, g2, bt2, m2, v2, a_end)
    out = jax.block_until_ready(out)

    ref = _reference(x, w1, b1, g1, bt1, m1, v1, a1,
                     w2, b2, g2, bt2, m2, v2, a_end, eps)
    ref = jax.block_until_ready(ref)

    # Tolerance accounts for bf16 MXU operands (f32 accumulation, f32 epilogue).
    np.testing.assert_allclose(np.asarray(out), np.asarray(ref),
                               rtol=2e-2, atol=2e-2)
    print("KERNEL_OK")
</pallas_src>

<mosaic_0001>
module attributes {stable_mosaic.version = 11 : i64} {
  func.func @_basic_block_q3_kernel(%arg0: i32, %arg1: i32, %arg2: memref<1x32x256xf32, #tpu.memory_space<vmem>>, %arg3: memref<32x32xbf16, #tpu.memory_space<vmem>>, %arg4: memref<32x1xf32, #tpu.memory_space<vmem>>, %arg5: memref<32x1xf32, #tpu.memory_space<vmem>>, %arg6: memref<1x1xf32, #tpu.memory_space<vmem>>, %arg7: memref<32x32xbf16, #tpu.memory_space<vmem>>, %arg8: memref<32x1xf32, #tpu.memory_space<vmem>>, %arg9: memref<32x1xf32, #tpu.memory_space<vmem>>, %arg10: memref<1x1xf32, #tpu.memory_space<vmem>>, %arg11: memref<1x32x256xf32, #tpu.memory_space<vmem>>) attributes {dimension_semantics = [#tpu.dimension_semantics<parallel>, #tpu.dimension_semantics<parallel>], iteration_bounds = array<i64: 2, 1>, scalar_prefetch = 0 : i64, scratch_operands = 0 : i64, tpu.core_type = #tpu.core_type<tc>, window_params = [{transform_indices = @transform_0, window_bounds = array<i64: 1, 32, 256>}, {pipeline_mode = #tpu.pipeline_mode<synchronous>, transform_indices = @transform_1, window_bounds = array<i64: 32, 32>}, {pipeline_mode = #tpu.pipeline_mode<synchronous>, transform_indices = @transform_2, window_bounds = array<i64: 32, 1>}, {pipeline_mode = #tpu.pipeline_mode<synchronous>, transform_indices = @transform_3, window_bounds = array<i64: 32, 1>}, {pipeline_mode = #tpu.pipeline_mode<synchronous>, transform_indices = @transform_4, window_bounds = array<i64: 1, 1>}, {pipeline_mode = #tpu.pipeline_mode<synchronous>, transform_indices = @transform_5, window_bounds = array<i64: 32, 32>}, {pipeline_mode = #tpu.pipeline_mode<synchronous>, transform_indices = @transform_6, window_bounds = array<i64: 32, 1>}, {pipeline_mode = #tpu.pipeline_mode<synchronous>, transform_indices = @transform_7, window_bounds = array<i64: 32, 1>}, {pipeline_mode = #tpu.pipeline_mode<synchronous>, transform_indices = @transform_8, window_bounds = array<i64: 1, 1>}, {transform_indices = @transform_9, window_bounds = array<i64: 1, 32, 256>}]} {
    %c0 = arith.constant 0 : index
    %c0_0 = arith.constant 0 : index
    %c0_1 = arith.constant 0 : index
    %0 = vector.load %arg2[%c0, %c0_0, %c0_1] : memref<1x32x256xf32, #tpu.memory_space<vmem>>, vector<1x32x256xf32>
    %1 = vector.shape_cast %0 : vector<1x32x256xf32> to vector<32x256xf32>
    %c0_2 = arith.constant 0 : index
    %c0_3 = arith.constant 0 : index
    %2 = vector.load %arg3[%c0_2, %c0_3] : memref<32x32xbf16, #tpu.memory_space<vmem>>, vector<32x32xbf16>
    %3 = arith.truncf %1 : vector<32x256xf32> to vector<32x256xbf16>
    %cst = arith.constant dense<0.000000e+00> : vector<32x256xf32>
    %4 = tpu.matmul %2, %3, %cst {dimension_numbers = #tpu.dot_dimension_numbers<[1], [0], [0], [1], [0, 0, 1, 1], [], []>} : vector<32x32xbf16>, vector<32x256xbf16>, vector<32x256xf32> -> vector<32x256xf32>
    %c0_4 = arith.constant 0 : index
    %c0_5 = arith.constant 0 : index
    %5 = vector.load %arg4[%c0_4, %c0_5] : memref<32x1xf32, #tpu.memory_space<vmem>>, vector<32x1xf32>
    %6 = vector.broadcast %5 : vector<32x1xf32> to vector<32x256xf32>
    %7 = arith.mulf %4, %6 : vector<32x256xf32>
    %c0_6 = arith.constant 0 : index
    %c0_7 = arith.constant 0 : index
    %8 = vector.load %arg5[%c0_6, %c0_7] : memref<32x1xf32, #tpu.memory_space<vmem>>, vector<32x1xf32>
    %9 = vector.broadcast %8 : vector<32x1xf32> to vector<32x256xf32>
    %10 = arith.addf %7, %9 : vector<32x256xf32>
    %c0_8 = arith.constant 0 : index
    %c0_9 = arith.constant 0 : index
    %11 = vector.load %arg6[%c0_8, %c0_9] : memref<1x1xf32, #tpu.memory_space<vmem>>, vector<1x1xf32>
    %12 = vector.extract %11[0, 0] : f32 from vector<1x1xf32>
    %cst_10 = arith.constant 0.000000e+00 : f32
    %13 = vector.broadcast %cst_10 : f32 to vector<32x256xf32>
    %14 = arith.cmpf ogt, %10, %13 : vector<32x256xf32>
    %15 = vector.broadcast %12 : f32 to vector<32x256xf32>
    %16 = arith.mulf %15, %10 : vector<32x256xf32>
    %17 = arith.select %14, %10, %16 : vector<32x256xi1>, vector<32x256xf32>
    %c0_11 = arith.constant 0 : index
    %c0_12 = arith.constant 0 : index
    %18 = vector.load %arg7[%c0_11, %c0_12] : memref<32x32xbf16, #tpu.memory_space<vmem>>, vector<32x32xbf16>
    %19 = arith.truncf %17 : vector<32x256xf32> to vector<32x256xbf16>
    %cst_13 = arith.constant dense<0.000000e+00> : vector<32x256xf32>
    %20 = tpu.matmul %18, %19, %cst_13 {dimension_numbers = #tpu.dot_dimension_numbers<[1], [0], [0], [1], [0, 0, 1, 1], [], []>} : vector<32x32xbf16>, vector<32x256xbf16>, vector<32x256xf32> -> vector<32x256xf32>
    %c0_14 = arith.constant 0 : index
    %c0_15 = arith.constant 0 : index
    %21 = vector.load %arg8[%c0_14, %c0_15] : memref<32x1xf32, #tpu.memory_space<vmem>>, vector<32x1xf32>
    %22 = vector.broadcast %21 : vector<32x1xf32> to vector<32x256xf32>
    %23 = arith.mulf %20, %22 : vector<32x256xf32>
    %c0_16 = arith.constant 0 : index
    %c0_17 = arith.constant 0 : index
    %24 = vector.load %arg9[%c0_16, %c0_17] : memref<32x1xf32, #tpu.memory_space<vmem>>, vector<32x1xf32>
    %25 = vector.broadcast %24 : vector<32x1xf32> to vector<32x256xf32>
    %26 = arith.addf %23, %25 : vector<32x256xf32>
    %27 = arith.addf %26, %1 : vector<32x256xf32>
    %c0_18 = arith.constant 0 : index
    %c0_19 = arith.constant 0 : index
    %28 = vector.load %arg10[%c0_18, %c0_19] : memref<1x1xf32, #tpu.memory_space<vmem>>, vector<1x1xf32>
    %29 = vector.extract %28[0, 0] : f32 from vector<1x1xf32>
    %cst_20 = arith.constant 0.000000e+00 : f32
    %30 = vector.broadcast %cst_20 : f32 to vector<32x256xf32>
    %31 = arith.cmpf ogt, %27, %30 : vector<32x256xf32>
    %32 = vector.broadcast %29 : f32 to vector<32x256xf32>
    %33 = arith.mulf %32, %27 : vector<32x256xf32>
    %34 = arith.select %31, %27, %33 : vector<32x256xi1>, vector<32x256xf32>
    %c0_21 = arith.constant 0 : index
    %c0_22 = arith.constant 0 : index
    %c0_23 = arith.constant 0 : index
    %35 = vector.load %arg11[%c0_21, %c0_22, %c0_23] : memref<1x32x256xf32, #tpu.memory_space<vmem>>, vector<1x32x256xf32>
    %36 = vector.shape_cast %35 : vector<1x32x256xf32> to vector<32x256xf32>
    %37 = vector.shape_cast %34 : vector<32x256xf32> to vector<1x32x256xf32>
    tpu.vector_store %arg11[%c0_21, %c0_22, %c0_23], %37 {strides = array<i32>} : memref<1x32x256xf32, #tpu.memory_space<vmem>>, vector<1x32x256xf32>,
    return
  }
  func.func @transform_0(%arg0: i32, %arg1: i32) -> (i32, i32, i32) {
    %c0_i32 = arith.constant 0 : i32
    %c0_i32_0 = arith.constant 0 : i32
    return %arg0, %c0_i32, %arg1 : i32, i32, i32
  }
  func.func @transform_1(%arg0: i32, %arg1: i32) -> (i32, i32) {
    %c0_i32 = arith.constant 0 : i32
    %c0_i32_0 = arith.constant 0 : i32
    %c0_i32_1 = arith.constant 0 : i32
    return %c0_i32, %c0_i32_0 : i32, i32
  }
  func.func @transform_2(%arg0: i32, %arg1: i32) -> (i32, i32) {
    %c0_i32 = arith.constant 0 : i32
    %c0_i32_0 = arith.constant 0 : i32
    %c0_i32_1 = arith.constant 0 : i32
    return %c0_i32, %c0_i32_0 : i32, i32
  }
  func.func @transform_3(%arg0: i32, %arg1: i32) -> (i32, i32) {
    %c0_i32 = arith.constant 0 : i32
    %c0_i32_0 = arith.constant 0 : i32
    %c0_i32_1 = arith.constant 0 : i32
    return %c0_i32, %c0_i32_0 : i32, i32
  }
  func.func @transform_4(%arg0: i32, %arg1: i32) -> (i32, i32) {
    %c0_i32 = arith.constant 0 : i32
    %c0_i32_0 = arith.constant 0 : i32
    %c0_i32_1 = arith.constant 0 : i32
    return %c0_i32, %c0_i32_0 : i32, i32
  }
  func.func @transform_5(%arg0: i32, %arg1: i32) -> (i32, i32) {
    %c0_i32 = arith.constant 0 : i32
    %c0_i32_0 = arith.constant 0 : i32
    %c0_i32_1 = arith.constant 0 : i32
    return %c0_i32, %c0_i32_0 : i32, i32
  }
  func.func @transform_6(%arg0: i32, %arg1: i32) -> (i32, i32) {
    %c0_i32 = arith.constant 0 : i32
    %c0_i32_0 = arith.constant 0 : i32
    %c0_i32_1 = arith.constant 0 : i32
    return %c0_i32, %c0_i32_0 : i32, i32
  }
  func.func @transform_7(%arg0: i32, %arg1: i32) -> (i32, i32) {
    %c0_i32 = arith.constant 0 : i32
    %c0_i32_0 = arith.constant 0 : i32
    %c0_i32_1 = arith.constant 0 : i32
    return %c0_i32, %c0_i32_0 : i32, i32
  }
  func.func @transform_8(%arg0: i32, %arg1: i32) -> (i32, i32) {
    %c0_i32 = arith.constant 0 : i32
    %c0_i32_0 = arith.constant 0 : i32
    %c0_i32_1 = arith.constant 0 : i32
    return %c0_i32, %c0_i32_0 : i32, i32
  }
  func.func @transform_9(%arg0: i32, %arg1: i32) -> (i32, i32, i32) {
    %c0_i32 = arith.constant 0 : i32
    %c0_i32_0 = arith.constant 0 : i32
    return %arg0, %c0_i32, %arg1 : i32, i32, i32
  }
}

</mosaic_0001>

<bundles_post_ra>
// kernel: basic_block_q3.1
= control target key start
LH: loop header
LB: loop body
LE: loop exit
PB: predicated region body
PF: predicated region fallthrough
CT: control target
= control target key end

     0   :  { %s949_s13 = smov 0   ;;  %s951_s14 = smov 0   ;;  %s1100_s0 = inlined_call_operand.vmem [shape: f32[2,32,256], index: 0, kind: input, shape index: {}]   ;;  %s1101_s1 = inlined_call_operand.vmem [shape: bf16[32,32], index: 1, kind: input, shape index: {}]   ;;  %s1102_s2 = inlined_call_operand.vmem [shape: f32[32,1], index: 2, kind: input, shape index: {}]   ;;  %s1103_s3 = inlined_call_operand.vmem [shape: f32[32,1], index: 3, kind: input, shape index: {}]   ;;  %s1104_s4 = inlined_call_operand.<no memory space> [shape: f32[1,1], index: 4, kind: input, shape index: {}]   ;;  %s1105_s5 = inlined_call_operand.vmem [shape: bf16[32,32], index: 5, kind: input, shape index: {}]   ;;  %s1106_s6 = inlined_call_operand.vmem [shape: f32[32,1], index: 6, kind: input, shape index: {}]   ;;  %s1107_s7 = inlined_call_operand.vmem [shape: f32[32,1], index: 7, kind: input, shape index: {}]   ;;  %s1108_s9 = inlined_call_operand.vmem [shape: f32[2,32,256], index: 9, kind: output, shape index: {}]   ;;  %s1109_s8 = inlined_call_operand.<no memory space> [shape: f32[1,1], index: 8, kind: input, shape index: {}]  }
   0x1   :  { %v14_v0 = vstv %s1104_s4  ;;  %v16_v1 = vstv %s1109_s8  ;;  %s953_s15 = smov 0  }
   0x2   :  { %15 = vst [vmem:[#allocation2] sm:$0x1] %v14_v0 }
   0x3   :  { %17 = vst [vmem:[#allocation3] sm:$0x1] %v16_v1 }
   0x4 LB: > { %s35_s4 = sadd.s32 1, %s886_s14  ;;  %p799_p0 = scmp.ge.s32.totalorder %s890_s15, 1  ;;  %s890_s15 = sphi %s953_s15, %s23_s15   ;;  %s886_s14 = sphi %s951_s14, %s1111_s14   ;;  %s882_s13 = sphi %s949_s13, %s1110_s13  }
   0x5   : > { %p37_p1 = scmp.ge.s32.totalorder %s35_s4, 2  ;;  %p312_p2 = scmp.lt.s32.totalorder %s890_s15, 3 }
   0x7   : > { %s1113_s4 = smov (%p37_p1, %s35_s4), 0  ;;  %p313_p3 = pnand %p799_p0, %p312_p2 }
   0x8   : > { %p357_p4 = scmp.lt.s32.totalorder (!%p313_p3), %s882_s13, 1 }
   0x9   : > { %316 = sbr.rel (%p313_p3) target bundleno = 361 (0x169), region = 56 }
   0xe   : > { %v450_v2 = vld [vmem:[%s1102_s2 + $0x10] sm:$0xff]  ;;  %v892_v4 = vmov 0   ;;  %s1115_s13 = smov (!%p357_p4, %s882_s13), 1  ;;  %v448_v5 = vld [vmem:[%s1102_s2] sm:$0xff]  ;;  %v451_v6 = vld [vmem:[%s1102_s2 + $0x18] sm:$0xff]  ;;  %vm403_vm0 = vcmask 261120  }
   0xf   : > { %v482_v3 = vld [vmem:[%s1103_s3 + $0x10] sm:$0xff]  ;;  %865 = vset.pattern.permute.xlu0 %v892_v4  ;;  %866 = vset.pattern.permute.xlu1 %v892_v4  ;;  %s830_s21 = sshll.u32 %s1115_s13, 6  ;;  %v483_v17 = vld [vmem:[%s1103_s3 + $0x18] sm:$0xff]  ;;  %v449_v20 = vld [vmem:[%s1102_s2 + $0x8] sm:$0xff] }
  0x10   : > { %464 = vperm.xlu0 %865, %v450_v2   ;;  %496 = vperm.xlu1 %866, %v482_v3   ;;  %s364_s24 = scalar_lea.vmem %s1100_s0, %s830_s21  ;;  %v512_v21 = vld [vmem:[#allocation2] sm:$0x1]  ;;  %v481_v24 = vld [vmem:[%s1103_s3 + $0x8] sm:$0xff]  ;;  %v603_v27 = vld [vmem:[%s1106_s6 + $0x10] sm:$0xff]  ;;  %s1075_s27 = scalar_lea.vmem %s1108_s9, %s830_s21 }
  0x11   : > { %867 = vset.pattern.permute.xlu2 %v892_v4  ;;  %v987_v7 = vld [vmem:[%s364_s24 + $0x20] sm:$0xff]  ;;  %v989_v8 = vld [vmem:[%s364_s24 + $0x30] sm:$0xff]  ;;  %v991_v9 = vld [vmem:[%s364_s24 + $0x28] sm:$0xff]  ;;  %836 = vpush %v512_v21 }
  0x12   : > { %454 = vperm.xlu2 %867, %v448_v5   ;;  %v391_v10 = vpack.c.bf16 %v989_v8, %v987_v7  ;;  %v995_v11 = vld [vmem:[%s364_s24 + $0x38] sm:$0xff]  ;;  %v997_v12 = vld [vmem:[%s364_s24] sm:$0xff]  ;;  %v999_v13 = vld [vmem:[%s364_s24 + $0x10] sm:$0xff] }
  0x13   : > { %v392_v14 = vpack.c.bf16 %v995_v11, %v991_v9  ;;  %v1003_v15 = vld [vmem:[%s364_s24 + $0x8] sm:$0xff]  ;;  %v1005_v16 = vld [vmem:[%s364_s24 + $0x18] sm:$0xff]  ;;  %v389_v18 = vpack.c.bf16 %v999_v13, %v997_v12  ;;  %v832_v22 = vld [vmem:[%s1101_s1] sm:$0xff] }
  0x14   : > { %416 = vmatpush.bf16.msra.mxu0 %v391_v10  ;;  %v390_v19 = vpack.c.bf16 %v1005_v16, %v1003_v15  ;;  %v480_v23 = vld [vmem:[%s1103_s3] sm:$0xff]  ;;  %v602_v26 = vld [vmem:[%s1106_s6 + $0x8] sm:$0xff]  ;;  %v604_v28 = vld [vmem:[%s1106_s6 + $0x18] sm:$0xff] }
  0x15   : > { %435 = vmatpush.bf16.msra.mxu1 %v392_v14  ;;  %v601_v25 = vld [vmem:[%s1106_s6] sm:$0xff]  ;;  %v833_v29 = vld [vmem:[%s1101_s1 + $0x8] sm:$0xff]  ;;  %v635_v32 = vld [vmem:[%s1107_s7 + $0x10] sm:$0xff] }
  0x16   : > { %v633_v30 = vld [vmem:[%s1107_s7] sm:$0xff]  ;;  %v634_v31 = vld [vmem:[%s1107_s7 + $0x8] sm:$0xff]  ;;  %v636_v33 = vld [vmem:[%s1107_s7 + $0x18] sm:$0xff] }
  0x17   : > { %v673_v0 = vld [vmem:[#allocation3] sm:$0x1] }
  0x18   : > { %469 = vperm.xlu0 %865, %v451_v6   ;;  %501 = vperm.xlu1 %866, %v483_v17   ;;  %838 = vpush %v673_v0 }
  0x19   : > { %417 = vmatpush.bf16.msra.mxu0 %v389_v18  ;;  %436 = vmatpush.bf16.msra.mxu1 %v390_v19 }
  0x1a   : > { %459 = vperm.xlu2 %867, %v449_v20  }
  0x1c   : > { %812 = vmatmul.msk.bf16.vlgmr.msra.gmra.mxu0 %vm403_vm0, %v832_v22  ;;  %814 = vmatmul.msk.bf16.vlgmr.msra.gmra.mxu1 %vm403_vm0, %v832_v22 }
  0x20   : > { %486 = vperm.xlu0 %865, %v480_v23   ;;  %491 = vperm.xlu1 %866, %v481_v24  }
  0x22   : > { %607 = vperm.xlu2 %867, %v601_v25  }
  0x28   : > { %612 = vperm.xlu0 %865, %v602_v26   ;;  %617 = vperm.xlu1 %866, %v603_v27  }
  0x2a   : > { %622 = vperm.xlu2 %867, %v604_v28  }
  0x2c   : > { %813 = vmatmul.msk.bf16.gmra.mxu0 %vm403_vm0, %v833_v29  ;;  %815 = vmatmul.msk.bf16.gmra.mxu1 %vm403_vm0, %v833_v29 }
  0x30   : > { %639 = vperm.xlu0 %865, %v633_v30   ;;  %644 = vperm.xlu1 %866, %v634_v31  }
  0x32   : > { %649 = vperm.xlu2 %867, %v635_v32   ;;  %v834_v32 = vld [vmem:[%s1105_s5] sm:$0xff] }
  0x38   : > { %654 = vperm.xlu0 %865, %v636_v33   ;;  %v835_v33 = vld [vmem:[%s1105_s5 + $0x8] sm:$0xff] }
  0x42   : > { %s837_s18 = spop %836 }
  0x43   : > { %v522_v61 = vstv %s837_s18 }
  0x49   : > { %s839_s24 = spop %838 }
  0x6c   : > { %v455_v40 = vpop.permute.xlu2 %454 }
  0x74   : > { %v460_v46 = vpop.permute.xlu2 %459 }
  0x82   : > { %v465_v36 = vpop.permute.xlu0 %464  ;;  %v497_v37 = vpop.permute.xlu1 %496 }
  0x8a   : > { %v470_v41 = vpop.permute.xlu0 %469  ;;  %v502_v42 = vpop.permute.xlu1 %501 }
  0x92   : > { %v487_v51 = vpop.permute.xlu0 %486  ;;  %v492_v54 = vpop.permute.xlu1 %491 }
  0x99   : > { %v419_v34 = vpop.f32.mrf.mxu0  ;;  %v438_v35 = vpop.f32.mrf.mxu1 }
  0x9a   : > { %v472_v47 = vmul.f32 %v455_v40, %v419_v34  ;;  %v473_v52 = vmul.f32 %v455_v40, %v438_v35  ;;  %v613_v34 = vpop.permute.xlu0 %612  ;;  %v608_v35 = vpop.permute.xlu2 %607 }
  0x9c   : > { %v504_v55 = vadd.f32 %v487_v51, %v472_v47  ;;  %v505_v1 = vadd.f32 %v487_v51, %v473_v52 }
  0x9e   : > { %vm514_vm2 = vcmp.gt.f32.partialorder %v504_v55, 0.0  ;;  %v523_v20 = vmul.f32 %v522_v61, %v504_v55  ;;  %v524_v24 = vmul.f32 %v522_v61, %v505_v1  ;;  %vm515_vm8 = vcmp.gt.f32.partialorder %v505_v1, 0.0 }
  0xa0   : > { %v531_v28 = vsel %vm514_vm2, %v504_v55, %v523_v20  ;;  %v532_v30 = vsel %vm515_vm8, %v505_v1, %v524_v24 }
  0xa1   : > { %v421_v38 = vpop.f32.mrf.mxu0  ;;  %v440_v39 = vpop.f32.mrf.mxu1 }
  0xa2   : > { %v474_v49 = vmul.f32 %v460_v46, %v421_v38  ;;  %v475_v50 = vmul.f32 %v460_v46, %v440_v39  ;;  %v640_v40 = vpop.permute.xlu0 %639 }
  0xa4   : > { %v506_v58 = vadd.f32 %v492_v54, %v474_v49  ;;  %v507_v62 = vadd.f32 %v492_v54, %v475_v50 }
  0xa6   : > { %v525_v10 = vmul.f32 %v522_v61, %v506_v58  ;;  %vm516_vm6 = vcmp.gt.f32.partialorder %v506_v58, 0.0  ;;  %v526_v17 = vmul.f32 %v522_v61, %v507_v62  ;;  %vm517_vm7 = vcmp.gt.f32.partialorder %v507_v62, 0.0 }
  0xa8   : > { %v533_v26 = vsel %vm516_vm6, %v506_v58, %v525_v10  ;;  %v534_v27 = vsel %vm517_vm7, %v507_v62, %v526_v17 }
  0xa9   : > { %v424_v43 = vpop.f32.mrf.mxu0  ;;  %v443_v44 = vpop.f32.mrf.mxu1  ;;  %v543_v29 = vpack.c.bf16 %v533_v26, %v531_v28  ;;  %v544_v31 = vpack.c.bf16 %v534_v27, %v532_v30 }
  0xaa   : > { %v476_v45 = vmul.f32 %v465_v36, %v424_v43  ;;  %v477_v48 = vmul.f32 %v465_v36, %v443_v44  ;;  %v618_v36 = vpop.permute.xlu1 %617  ;;  %v683_v44 = vstv %s839_s24  ;;  %v655_v20 = vpop.permute.xlu0 %654 }
  0xac   : > { %v508_v53 = vadd.f32 %v497_v37, %v476_v45  ;;  %v509_v56 = vadd.f32 %v497_v37, %v477_v48  ;;  %v623_v48 = vpop.permute.xlu2 %622 }
  0xae   : > { %v527_v3 = vmul.f32 %v522_v61, %v508_v53  ;;  %vm518_vm1 = vcmp.gt.f32.partialorder %v508_v53, 0.0  ;;  %v528_v5 = vmul.f32 %v522_v61, %v509_v56  ;;  %vm519_vm4 = vcmp.gt.f32.partialorder %v509_v56, 0.0 }
  0xb0   : > { %v535_v18 = vsel %vm518_vm1, %v508_v53, %v527_v3  ;;  %v536_v22 = vsel %vm519_vm4, %v509_v56, %v528_v5 }
  0xb1   : > { %v426_v57 = vpop.f32.mrf.mxu0  ;;  %v445_v60 = vpop.f32.mrf.mxu1 }
  0xb2   : > { %v478_v59 = vmul.f32 %v470_v41, %v426_v57  ;;  %v479_v63 = vmul.f32 %v470_v41, %v445_v60 }
  0xb4   : > { %v510_v2 = vadd.f32 %v502_v42, %v478_v59  ;;  %v511_v4 = vadd.f32 %v502_v42, %v479_v63  ;;  %v650_v1 = vpop.permute.xlu2 %649 }
  0xb6   : > { %vm520_vm3 = vcmp.gt.f32.partialorder %v510_v2, 0.0  ;;  %v529_v6 = vmul.f32 %v522_v61, %v510_v2  ;;  %vm521_vm5 = vcmp.gt.f32.partialorder %v511_v4, 0.0  ;;  %v530_v14 = vmul.f32 %v522_v61, %v511_v4 }
  0xb8   : > { %v537_v19 = vsel %vm520_vm3, %v510_v2, %v529_v6  ;;  %v538_v23 = vsel %vm521_vm5, %v511_v4, %v530_v14 }
  0xb9   : > { %v545_v21 = vpack.c.bf16 %v537_v19, %v535_v18  ;;  %v546_v25 = vpack.c.bf16 %v538_v23, %v536_v22 }
  0xbb   : > { %569 = vmatpush.bf16.msra.mxu2 %v545_v21  ;;  %588 = vmatpush.bf16.msra.mxu3 %v546_v25 }
  0xbf   : > { %570 = vmatpush.bf16.msra.mxu2 %v543_v29  ;;  %589 = vmatpush.bf16.msra.mxu3 %v544_v31 }
  0xc2   : > { %824 = vmatmul.msk.bf16.vlgmr.msra.gmra.mxu2 %vm403_vm0, %v834_v32  ;;  %826 = vmatmul.msk.bf16.vlgmr.msra.gmra.mxu3 %vm403_vm0, %v834_v32 }
  0xd2   : > { %825 = vmatmul.msk.bf16.gmra.mxu2 %vm403_vm0, %v835_v33  ;;  %827 = vmatmul.msk.bf16.gmra.mxu3 %vm403_vm0, %v835_v33 }
 0x145   : > { %v572_v37 = vpop.f32.mrf.mxu2  ;;  %v591_v39 = vpop.f32.mrf.mxu3 }
 0x146   : > { %v625_v38 = vmul.f32 %v608_v35, %v572_v37  ;;  %v626_v41 = vmul.f32 %v608_v35, %v591_v39 }
 0x148   : > { %v657_v42 = vadd.f32 %v640_v40, %v625_v38  ;;  %v658_v43 = vadd.f32 %v640_v40, %v626_v41 }
 0x14a   : > { %v665_v45 = vadd.f32 %v657_v42, %v997_v12  ;;  %v666_v46 = vadd.f32 %v658_v43, %v1003_v15  ;;  %v645_v12 = vpop.permute.xlu1 %644 }
 0x14c   : > { %vm675_vm9 = vcmp.gt.f32.partialorder %v665_v45, 0.0  ;;  %v684_v47 = vmul.f32 %v683_v44, %v665_v45  ;;  %vm676_vm10 = vcmp.gt.f32.partialorder %v666_v46, 0.0  ;;  %v685_v49 = vmul.f32 %v683_v44, %v666_v46 }
 0x14d   : > { %v574_v50 = vpop.f32.mrf.mxu2  ;;  %v593_v53 = vpop.f32.mrf.mxu3 }
 0x14e   : > { %v692_v51 = vsel %vm675_vm9, %v665_v45, %v684_v47  ;;  %v627_v52 = vmul.f32 %v613_v34, %v574_v50  ;;  %v693_v54 = vsel %vm676_vm10, %v666_v46, %v685_v49  ;;  %v628_v15 = vmul.f32 %v613_v34, %v593_v53 }
 0x14f   : > { %700 = vst [vmem:[%s1075_s27] sm:$0xff] %v692_v51 }
 0x150   : > { %701 = vst [vmem:[%s1075_s27 + $0x8] sm:$0xff] %v693_v54  ;;  %v659_v55 = vadd.f32 %v645_v12, %v627_v52  ;;  %v660_v56 = vadd.f32 %v645_v12, %v628_v15 }
 0x152   : > { %v667_v57 = vadd.f32 %v659_v55, %v999_v13  ;;  %v668_v58 = vadd.f32 %v660_v56, %v1005_v16 }
 0x154   : > { %vm677_vm11 = vcmp.gt.f32.partialorder %v667_v57, 0.0  ;;  %v686_v59 = vmul.f32 %v683_v44, %v667_v57  ;;  %vm678_vm12 = vcmp.gt.f32.partialorder %v668_v58, 0.0  ;;  %v687_v60 = vmul.f32 %v683_v44, %v668_v58 }
 0x155   : > { %v577_v61 = vpop.f32.mrf.mxu2  ;;  %v596_v0 = vpop.f32.mrf.mxu3 }
 0x156   : > { %v694_v62 = vsel %vm677_vm11, %v667_v57, %v686_v59  ;;  %v629_v63 = vmul.f32 %v618_v36, %v577_v61  ;;  %v695_v2 = vsel %vm678_vm12, %v668_v58, %v687_v60  ;;  %v630_v3 = vmul.f32 %v618_v36, %v596_v0 }
 0x157   : > { %702 = vst [vmem:[%s1075_s27 + $0x10] sm:$0xff] %v694_v62 }
 0x158   : > { %703 = vst [vmem:[%s1075_s27 + $0x18] sm:$0xff] %v695_v2  ;;  %v661_v4 = vadd.f32 %v650_v1, %v629_v63  ;;  %v662_v5 = vadd.f32 %v650_v1, %v630_v3 }
 0x15a   : > { %v669_v13 = vadd.f32 %v661_v4, %v987_v7  ;;  %v670_v16 = vadd.f32 %v662_v5, %v991_v9 }
 0x15c   : > { %vm679_vm13 = vcmp.gt.f32.partialorder %v669_v13, 0.0  ;;  %v688_v6 = vmul.f32 %v683_v44, %v669_v13  ;;  %vm680_vm14 = vcmp.gt.f32.partialorder %v670_v16, 0.0  ;;  %v689_v10 = vmul.f32 %v683_v44, %v670_v16 }
 0x15d   : > { %v579_v14 = vpop.f32.mrf.mxu2  ;;  %v598_v19 = vpop.f32.mrf.mxu3 }
 0x15e   : > { %v696_v17 = vsel %vm679_vm13, %v669_v13, %v688_v6  ;;  %v631_v18 = vmul.f32 %v623_v48, %v579_v14  ;;  %v697_v21 = vsel %vm680_vm14, %v670_v16, %v689_v10  ;;  %v632_v22 = vmul.f32 %v623_v48, %v598_v19 }
 0x15f   : > { %704 = vst [vmem:[%s1075_s27 + $0x20] sm:$0xff] %v696_v17 }
 0x160   : > { %705 = vst [vmem:[%s1075_s27 + $0x28] sm:$0xff] %v697_v21  ;;  %v663_v23 = vadd.f32 %v655_v20, %v631_v18  ;;  %v664_v24 = vadd.f32 %v655_v20, %v632_v22 }
 0x162   : > { %v671_v7 = vadd.f32 %v663_v23, %v989_v8  ;;  %v672_v9 = vadd.f32 %v664_v24, %v995_v11 }
 0x164   : > { %vm681_vm15 = vcmp.gt.f32.partialorder %v671_v7, 0.0  ;;  %v690_v25 = vmul.f32 %v683_v44, %v671_v7  ;;  %vm682_vm0 = vcmp.gt.f32.partialorder %v672_v9, 0.0  ;;  %v691_v26 = vmul.f32 %v683_v44, %v672_v9 }
 0x166   : > { %v698_v27 = vsel %vm681_vm15, %v671_v7, %v690_v25  ;;  %v699_v28 = vsel %vm682_vm0, %v672_v9, %v691_v26 }
 0x167   : > { %706 = vst [vmem:[%s1075_s27 + $0x30] sm:$0xff] %v698_v27 }
 0x168   : > { %707 = vst [vmem:[%s1075_s27 + $0x38] sm:$0xff] %v699_v28 }
 0x169 PF: > { %s23_s15 = sadd.s32 1, %s890_s15   ;;  %s1110_s13 = smov %s886_s14 }
 0x16a   : > { %p20_p5 = scmp.ge.s32.totalorder %s23_s15, 4   ;;  %s1111_s14 = smov %s1113_s4 }
 0x16c   :  { %22 = sbr.rel (!%p20_p5) target bundleno = 4 (0x4), region = 86 }

</bundles_post_ra>
